<compile_context>
chip_gen: v7x
topology: tpu7x:2x2x1
jax: 0.10.0
libtpu: 0.0.40
codegen_flags: <defaults>
</compile_context>

<pallas_src>
import functools

import jax
import jax.numpy as jnp
from jax.experimental import pallas as pl
from jax.experimental.pallas import tpu as pltpu


_NEG_INF = -1e9  # matches torch masked_fill(-1000000000.0)


def _vmem_budget_bytes():
    """~80% of physical VMEM (v5e/v6e ~102 MiB, v7x ~51 MiB); 51 MiB fallback."""
    cap = 64 << 20
    try:
        info = pltpu.get_tpu_info()
        cap = int(getattr(info, "vmem_capacity_bytes", cap) or cap)
    except Exception:
        pass
    return int(cap * 0.8)


# ---------------------------------------------------------------------------
# Single-pass kernel: whole key axis resident per step (moderate L, and the
# only kernel that can also emit the full attention matrix).
# ---------------------------------------------------------------------------
def _attn_single_pass_kernel(*refs, H, d_qk, d_v, inv_temp, has_bias,
                             return_attn, approx_recip):
    q_ref, k_ref, v_ref = refs[0], refs[1], refs[2]
    idx = 3
    bias_ref = None
    if has_bias:
        bias_ref = refs[idx]
        idx += 1
    out_ref = refs[idx]
    attn_ref = refs[idx + 1] if return_attn else None

    # PyTorch (seq-major, head-interleaved) layout: [tq, H*d_qk] etc.
    # Temperature scale stays in the input dtype (no accidental f32 promotion
    # of a bf16 operand before the MXU).
    q = q_ref[0] * jnp.asarray(inv_temp, dtype=q_ref.dtype)    # [tq, H*d_qk]
    k = k_ref[0]                                               # [L,  H*d_qk]
    v = v_ref[0]                                               # [L,  H*d_v]
    bias = bias_ref[0].astype(jnp.float32) if has_bias else None   # [tq, L]

    outs = []
    for h in range(H):                       # un-interleave heads in VMEM
        qh = q[:, h * d_qk:(h + 1) * d_qk]                     # [tq, d_qk]
        kh = k[:, h * d_qk:(h + 1) * d_qk]                     # [L,  d_qk]
        # scores[i, j] = sum_d qh[i, d] * kh[j, d]  (contract last dims,
        # no explicit k.T on the critical path).
        s = jax.lax.dot_general(qh, kh, (((1,), (1,)), ((), ())),
                                preferred_element_type=jnp.float32)  # [tq, L]
        if has_bias:
            s = s + bias                     # additive -1e9 mask bias
        s_max = jnp.max(s, axis=-1, keepdims=True)
        e = jnp.exp(s - s_max)
        denom = jnp.sum(e, axis=-1, keepdims=True)             # [tq, 1]
        p = e * pl.reciprocal(denom, approx=approx_recip)      # [tq, L] f32
        # dropout: identity (eval mode)
        if return_attn:
            attn_ref[0, h] = p.astype(attn_ref.dtype)
        vh = v[:, h * d_v:(h + 1) * d_v]                       # [L, d_v]
        outs.append(jax.lax.dot_general(
            p.astype(v.dtype), vh, (((1,), (0,)), ((), ())),
            preferred_element_type=jnp.float32))               # [tq, d_v]

    # Lane-dense [tq, H*d_v] store in the PyTorch output layout.
    out_ref[0] = jnp.concatenate(outs, axis=-1).astype(out_ref.dtype)


# ---------------------------------------------------------------------------
# Flash-style key-tiled kernel (online softmax) for return_attn=False:
# bounds VMEM independent of L.  Key axis is the innermost ("arbitrary") grid
# axis; m/l/acc live in VMEM scratch across it.
# ---------------------------------------------------------------------------
def _attn_flash_kernel(*refs, H, d_qk, d_v, inv_temp, has_bias, approx_recip):
    q_ref, k_ref, v_ref = refs[0], refs[1], refs[2]
    idx = 3
    bias_ref = None
    if has_bias:
        bias_ref = refs[idx]
        idx += 1
    out_ref = refs[idx]
    m_ref, l_ref, acc_ref = refs[idx + 1], refs[idx + 2], refs[idx + 3]

    ik = pl.program_id(2)

    @pl.when(ik == 0)
    def _():
        m_ref[...] = jnp.full(m_ref.shape, -jnp.inf, dtype=m_ref.dtype)
        l_ref[...] = jnp.zeros(l_ref.shape, dtype=l_ref.dtype)
        acc_ref[...] = jnp.zeros(acc_ref.shape, dtype=acc_ref.dtype)

    q = q_ref[0] * jnp.asarray(inv_temp, dtype=q_ref.dtype)    # [tq, H*d_qk]
    k = k_ref[0]                                               # [tk, H*d_qk]
    v = v_ref[0]                                               # [tk, H*d_v]
    bias = bias_ref[0].astype(jnp.float32) if has_bias else None   # [tq, tk]

    for h in range(H):
        qh = q[:, h * d_qk:(h + 1) * d_qk]
        kh = k[:, h * d_qk:(h + 1) * d_qk]
        s = jax.lax.dot_general(qh, kh, (((1,), (1,)), ((), ())),
                                preferred_element_type=jnp.float32)  # [tq, tk]
        if has_bias:
            s = s + bias
        m_prev = m_ref[h]                                      # [tq, 1]
        m_new = jnp.maximum(m_prev, jnp.max(s, axis=-1, keepdims=True))
        alpha = jnp.exp(m_prev - m_new)
        p = jnp.exp(s - m_new)                                 # [tq, tk]
        l_ref[h] = alpha * l_ref[h] + jnp.sum(p, axis=-1, keepdims=True)
        vh = v[:, h * d_v:(h + 1) * d_v]
        acc_ref[h] = alpha * acc_ref[h] + jax.lax.dot_general(
            p.astype(v.dtype), vh, (((1,), (0,)), ((), ())),
            preferred_element_type=jnp.float32)
        m_ref[h] = m_new

    @pl.when(ik == pl.num_programs(2) - 1)
    def _():
        outs = [acc_ref[h] * pl.reciprocal(l_ref[h], approx=approx_recip)
                for h in range(H)]
        out_ref[0] = jnp.concatenate(outs, axis=-1).astype(out_ref.dtype)


# ---------------------------------------------------------------------------
# Wrapper: native PyTorch layout in and out, no HBM transposes.
# ---------------------------------------------------------------------------
def self_attn(q, k, v, mask=None, *, temperature=1.0, return_attn=True,
              key_block=None):
    """SelfAttn forward.

    q, k: [B, L, H, d_qk]; v: [B, L, H, d_v]
    mask: None, [L, L] or [B, L, L]; nonzero/True entries are masked out.
    Returns (output [B, L, H, d_v], attn [B, H, L, L] or None).
    `key_block` forces the flash (key-tiled) kernel with that key tile
    (return_attn must be False and L % key_block == 0).
    """
    B, L, H, d_qk = q.shape
    d_v = v.shape[-1]
    out_dtype = q.dtype
    isz = jnp.dtype(out_dtype).itemsize
    hdqk, hdv = H * d_qk, H * d_v

    # Free contiguous reshapes (no transpose, no HBM copy).
    q2 = q.reshape(B, L, hdqk)
    k2 = k.reshape(B, L, hdqk)
    v2 = v.reshape(B, L, hdv)

    has_bias = mask is not None
    bias = None
    per_batch_bias = False
    if has_bias:
        m = jnp.asarray(mask)
        if m.ndim == 2:
            m = m[None]
        per_batch_bias = m.shape[0] != 1
        # Additive bias: one VPU add in-kernel instead of unpack+compare+select.
        bias = jnp.where(m != 0, jnp.float32(_NEG_INF), jnp.float32(0.0))

    budget = _vmem_budget_bytes()
    approx_recip = bool(jnp.dtype(out_dtype) != jnp.float32)
    inv_temp = 1.0 / float(temperature)

    def single_pass_bytes(tq_):
        blocks = (tq_ * hdqk + L * hdqk + L * hdv + tq_ * hdv) * isz
        if has_bias:
            blocks += tq_ * L * 4
        if return_attn:
            blocks += H * tq_ * L * isz
        interm = 4 * tq_ * L * 4          # f32 s/e/p temporaries (now counted)
        return 2 * blocks + interm + (2 << 20)

    # Query tile: largest "nice" divisor of L whose working set fits budget.
    tq = L
    if L > 128:
        for t in (1024, 512, 256, 128):
            if L % t == 0 and single_pass_bytes(t) <= budget:
                tq = t
                break

    use_flash = (not return_attn) and L % 128 == 0 and (
        key_block is not None or single_pass_bytes(tq) > budget)

    if use_flash:
        if key_block is not None:
            tk = int(key_block)
            assert L % tk == 0, "key_block must divide L"
        else:
            tk = next((t for t in (1024, 512, 256, 128) if L % t == 0), 128)

        def flash_bytes(tq_, tk_):
            blocks = (tq_ * hdqk + tk_ * hdqk + tk_ * hdv + tq_ * hdv) * isz
            if has_bias:
                blocks += tq_ * tk_ * 4
            scratch = H * tq_ * (2 + d_v) * 4
            interm = 4 * tq_ * tk_ * 4
            return 2 * blocks + scratch + interm + (2 << 20)

        tq_f = 128
        for t in (1024, 512, 256, 128):
            if L % t == 0 and flash_bytes(t, tk) <= budget:
                tq_f = t
                break
        vmem_limit = int(min(budget, max(2 * flash_bytes(tq_f, tk), 32 << 20)))

        inputs = [q2, k2, v2]
        in_specs = [
            pl.BlockSpec((1, tq_f, hdqk), lambda b, iq, ik: (b, iq, 0)),
            pl.BlockSpec((1, tk, hdqk), lambda b, iq, ik: (b, ik, 0)),
            pl.BlockSpec((1, tk, hdv), lambda b, iq, ik: (b, ik, 0)),
        ]
        if has_bias:
            if per_batch_bias:
                in_specs.append(
                    pl.BlockSpec((1, tq_f, tk), lambda b, iq, ik: (b, iq, ik)))
            else:
                in_specs.append(
                    pl.BlockSpec((1, tq_f, tk), lambda b, iq, ik: (0, iq, ik)))
            inputs.append(bias)

        kernel = functools.partial(
            _attn_flash_kernel, H=H, d_qk=d_qk, d_v=d_v, inv_temp=inv_temp,
            has_bias=has_bias, approx_recip=approx_recip)

        out2 = pl.pallas_call(
            kernel,
            out_shape=jax.ShapeDtypeStruct((B, L, hdv), out_dtype),
            grid=(B, L // tq_f, L // tk),
            in_specs=in_specs,
            out_specs=pl.BlockSpec((1, tq_f, hdv), lambda b, iq, ik: (b, iq, 0)),
            scratch_shapes=[
                pltpu.VMEM((H, tq_f, 1), jnp.float32),     # running max
                pltpu.VMEM((H, tq_f, 1), jnp.float32),     # running denom
                pltpu.VMEM((H, tq_f, d_v), jnp.float32),   # running P.V acc
            ],
            compiler_params=pltpu.CompilerParams(
                dimension_semantics=("parallel", "parallel", "arbitrary"),
                vmem_limit_bytes=vmem_limit),
        )(*inputs)
        return out2.reshape(B, L, H, d_v), None

    # ---------------- single-pass path ----------------
    vmem_limit = int(min(budget, max(2 * single_pass_bytes(tq), 32 << 20)))

    inputs = [q2, k2, v2]
    in_specs = [
        pl.BlockSpec((1, tq, hdqk), lambda b, iq: (b, iq, 0)),
        pl.BlockSpec((1, L, hdqk), lambda b, iq: (b, 0, 0)),
        pl.BlockSpec((1, L, hdv), lambda b, iq: (b, 0, 0)),
    ]
    if has_bias:
        if per_batch_bias:
            in_specs.append(pl.BlockSpec((1, tq, L), lambda b, iq: (b, iq, 0)))
        else:
            in_specs.append(pl.BlockSpec((1, tq, L), lambda b, iq: (0, iq, 0)))
        inputs.append(bias)

    out_shapes = [jax.ShapeDtypeStruct((B, L, hdv), out_dtype)]
    out_specs = [pl.BlockSpec((1, tq, hdv), lambda b, iq: (b, iq, 0))]
    if return_attn:
        out_shapes.append(jax.ShapeDtypeStruct((B, H, L, L), out_dtype))
        out_specs.append(pl.BlockSpec((1, H, tq, L), lambda b, iq: (b, 0, iq, 0)))

    kernel = functools.partial(
        _attn_single_pass_kernel, H=H, d_qk=d_qk, d_v=d_v, inv_temp=inv_temp,
        has_bias=has_bias, return_attn=return_attn, approx_recip=approx_recip)

    results = pl.pallas_call(
        kernel,
        out_shape=tuple(out_shapes),
        grid=(B, L // tq),
        in_specs=in_specs,
        out_specs=tuple(out_specs),
        compiler_params=pltpu.CompilerParams(
            # K/V blocks are invariant along the lq axis: keep lq "arbitrary"
            # so they stay resident (megacore shards on batch), no re-DMA.
            dimension_semantics=("parallel", "arbitrary"),
            vmem_limit_bytes=vmem_limit),
    )(*inputs)

    if return_attn:
        out2, attn = results
    else:
        out2 = results[0] if isinstance(results, (tuple, list)) else results
        attn = None
    return out2.reshape(B, L, H, d_v), attn


def _reference(q, k, v, mask, temperature):
    """Pure-JAX transcription of the torch forward (eval mode)."""
    qs = q / temperature
    attn = jnp.einsum('bjkl,bmkl->bkjm', qs, k)                 # [B, H, L, L]
    if mask is not None:
        m = mask if mask.ndim == 3 else mask[None]
        attn = jnp.where(m[:, None, :, :] != 0, _NEG_INF, attn)
    attn = jax.nn.softmax(attn, axis=-1)
    output = jnp.einsum('bjkl,bljn->bkjn', attn, v)             # [B, L, H, Dv]
    return output, attn


if __name__ == "__main__":
    B, L, H, Dqk, Dv = 2, 8, 4, 16, 16
    temperature = float(Dqk) ** 0.5

    key = jax.random.PRNGKey(0)
    kq, kk, kv = jax.random.split(key, 3)
    q = jax.random.normal(kq, (B, L, H, Dqk), dtype=jnp.float32)
    k = jax.random.normal(kk, (B, L, H, Dqk), dtype=jnp.float32)
    v = jax.random.normal(kv, (B, L, H, Dv), dtype=jnp.float32)

    # Causal (subsequent) mask, per-batch: nonzero => masked out.
    causal = jnp.triu(jnp.ones((L, L), dtype=jnp.int32), k=1)
    mask = jnp.broadcast_to(causal[None], (B, L, L))

    # 1) Masked path, both outputs (single-pass kernel).
    out, attn = self_attn(q, k, v, mask, temperature=temperature)
    out, attn = jax.block_until_ready((out, attn))
    ref_out, ref_attn = _reference(q, k, v, mask, temperature)
    assert out.shape == (B, L, H, Dv) and attn.shape == (B, H, L, L)
    assert jnp.allclose(out, ref_out, atol=1e-5, rtol=1e-5)
    assert jnp.allclose(attn, ref_attn, atol=1e-5, rtol=1e-5)

    # 2) No-mask path, attention writeback elided.
    out2, attn2 = self_attn(q, k, v, None, temperature=temperature,
                            return_attn=False)
    out2 = jax.block_until_ready(out2)
    ref_out2, _ = _reference(q, k, v, None, temperature)
    assert attn2 is None
    assert jnp.allclose(out2, ref_out2, atol=1e-5, rtol=1e-5)

    # 3) Flash (key-tiled online-softmax) path at a longer sequence, 2D mask.
    L2 = 256
    kq2, kk2, kv2 = jax.random.split(jax.random.PRNGKey(1), 3)
    q3 = jax.random.normal(kq2, (B, L2, H, Dqk), dtype=jnp.float32)
    k3 = jax.random.normal(kk2, (B, L2, H, Dqk), dtype=jnp.float32)
    v3 = jax.random.normal(kv2, (B, L2, H, Dv), dtype=jnp.float32)
    mask2 = jnp.triu(jnp.ones((L2, L2), dtype=jnp.int32), k=1)
    out3, attn3 = self_attn(q3, k3, v3, mask2, temperature=temperature,
                            return_attn=False, key_block=128)
    out3 = jax.block_until_ready(out3)
    ref_out3, _ = _reference(q3, k3, v3, mask2, temperature)
    assert attn3 is None
    assert jnp.allclose(out3, ref_out3, atol=1e-4, rtol=1e-4)

    print("KERNEL_OK")
</pallas_src>

<mosaic_0001>
module attributes {stable_mosaic.version = 11 : i64} {
  func.func @_attn_single_pass_kernel(%arg0: i32, %arg1: i32, %arg2: memref<1x8x64xf32, #tpu.memory_space<vmem>>, %arg3: memref<1x8x64xf32, #tpu.memory_space<vmem>>, %arg4: memref<1x8x64xf32, #tpu.memory_space<vmem>>, %arg5: memref<1x8x8xf32, #tpu.memory_space<vmem>>, %arg6: memref<1x8x64xf32, #tpu.memory_space<vmem>>, %arg7: memref<1x4x8x8xf32, #tpu.memory_space<vmem>>) attributes {dimension_semantics = [#tpu.dimension_semantics<parallel>, #tpu.dimension_semantics<arbitrary>], iteration_bounds = array<i64: 2, 1>, scalar_prefetch = 0 : i64, scratch_operands = 0 : i64, tpu.core_type = #tpu.core_type<tc>, window_params = [{transform_indices = @transform_0, window_bounds = array<i64: 1, 8, 64>}, {transform_indices = @transform_1, window_bounds = array<i64: 1, 8, 64>}, {transform_indices = @transform_2, window_bounds = array<i64: 1, 8, 64>}, {transform_indices = @transform_3, window_bounds = array<i64: 1, 8, 8>}, {transform_indices = @transform_4, window_bounds = array<i64: 1, 8, 64>}, {transform_indices = @transform_5, window_bounds = array<i64: 1, 4, 8, 8>}]} {
    %c0 = arith.constant 0 : index
    %c0_0 = arith.constant 0 : index
    %c0_1 = arith.constant 0 : index
    %0 = vector.load %arg2[%c0, %c0_0, %c0_1] : memref<1x8x64xf32, #tpu.memory_space<vmem>>, vector<1x8x64xf32>
    %1 = vector.shape_cast %0 : vector<1x8x64xf32> to vector<8x64xf32>
    %cst = arith.constant 2.500000e-01 : f32
    %2 = vector.broadcast %cst : f32 to vector<8x64xf32>
    %3 = arith.mulf %1, %2 : vector<8x64xf32>
    %c0_2 = arith.constant 0 : index
    %c0_3 = arith.constant 0 : index
    %c0_4 = arith.constant 0 : index
    %4 = vector.load %arg3[%c0_2, %c0_3, %c0_4] : memref<1x8x64xf32, #tpu.memory_space<vmem>>, vector<1x8x64xf32>
    %5 = vector.shape_cast %4 : vector<1x8x64xf32> to vector<8x64xf32>
    %c0_5 = arith.constant 0 : index
    %c0_6 = arith.constant 0 : index
    %c0_7 = arith.constant 0 : index
    %6 = vector.load %arg4[%c0_5, %c0_6, %c0_7] : memref<1x8x64xf32, #tpu.memory_space<vmem>>, vector<1x8x64xf32>
    %7 = vector.shape_cast %6 : vector<1x8x64xf32> to vector<8x64xf32>
    %c0_8 = arith.constant 0 : index
    %c0_9 = arith.constant 0 : index
    %c0_10 = arith.constant 0 : index
    %8 = vector.load %arg5[%c0_8, %c0_9, %c0_10] : memref<1x8x8xf32, #tpu.memory_space<vmem>>, vector<1x8x8xf32>
    %9 = vector.shape_cast %8 : vector<1x8x8xf32> to vector<8x8xf32>
    %10 = vector.extract_strided_slice %3 {offsets = [0, 0], sizes = [8, 16], strides = [1, 1]} : vector<8x64xf32> to vector<8x16xf32>
    %11 = vector.extract_strided_slice %5 {offsets = [0, 0], sizes = [8, 16], strides = [1, 1]} : vector<8x64xf32> to vector<8x16xf32>
    %cst_11 = arith.constant dense<0.000000e+00> : vector<8x8xf32>
    %12 = tpu.matmul %10, %11, %cst_11 {dimension_numbers = #tpu.dot_dimension_numbers<[1], [1], [0], [0], [0, 0, 1, 0], [], []>} : vector<8x16xf32>, vector<8x16xf32>, vector<8x8xf32> -> vector<8x8xf32>
    %13 = arith.addf %12, %9 : vector<8x8xf32>
    %cst_12 = arith.constant dense<0xFF800000> : vector<8xf32>
    %14 = vector.multi_reduction <maximumf>, %13, %cst_12 [1] : vector<8x8xf32> to vector<8xf32>
    %15 = vector.shape_cast %14 : vector<8xf32> to vector<8x1xf32>
    %16 = vector.broadcast %15 : vector<8x1xf32> to vector<8x8xf32>
    %17 = arith.subf %13, %16 : vector<8x8xf32>
    %18 = math.exp %17 : vector<8x8xf32>
    %cst_13 = arith.constant dense<0.000000e+00> : vector<8xf32>
    %19 = vector.multi_reduction <add>, %18, %cst_13 [1] : vector<8x8xf32> to vector<8xf32>
    %20 = vector.shape_cast %19 : vector<8xf32> to vector<8x1xf32>
    %21 = tpu.reciprocal %20 : vector<8x1xf32> -> vector<8x1xf32>
    %22 = vector.broadcast %21 : vector<8x1xf32> to vector<8x8xf32>
    %23 = arith.mulf %18, %22 : vector<8x8xf32>
    %c0_14 = arith.constant 0 : index
    %c0_15 = arith.constant 0 : index
    %c0_16 = arith.constant 0 : index
    %c0_17 = arith.constant 0 : index
    %24 = vector.load %arg7[%c0_14, %c0_15, %c0_16, %c0_17] : memref<1x4x8x8xf32, #tpu.memory_space<vmem>>, vector<1x1x8x8xf32>
    %25 = vector.shape_cast %24 : vector<1x1x8x8xf32> to vector<8x8xf32>
    %26 = vector.shape_cast %23 : vector<8x8xf32> to vector<1x1x8x8xf32>
    tpu.vector_store %arg7[%c0_14, %c0_15, %c0_16, %c0_17], %26 {strides = array<i32>} : memref<1x4x8x8xf32, #tpu.memory_space<vmem>>, vector<1x1x8x8xf32>,
    %27 = vector.extract_strided_slice %7 {offsets = [0, 0], sizes = [8, 16], strides = [1, 1]} : vector<8x64xf32> to vector<8x16xf32>
    %cst_18 = arith.constant dense<0.000000e+00> : vector<8x16xf32>
    %28 = tpu.matmul %23, %27, %cst_18 {dimension_numbers = #tpu.dot_dimension_numbers<[1], [0], [0], [1], [0, 0, 1, 1], [], []>} : vector<8x8xf32>, vector<8x16xf32>, vector<8x16xf32> -> vector<8x16xf32>
    %29 = vector.extract_strided_slice %3 {offsets = [0, 16], sizes = [8, 16], strides = [1, 1]} : vector<8x64xf32> to vector<8x16xf32>
    %30 = vector.extract_strided_slice %5 {offsets = [0, 16], sizes = [8, 16], strides = [1, 1]} : vector<8x64xf32> to vector<8x16xf32>
    %cst_19 = arith.constant dense<0.000000e+00> : vector<8x8xf32>
    %31 = tpu.matmul %29, %30, %cst_19 {dimension_numbers = #tpu.dot_dimension_numbers<[1], [1], [0], [0], [0, 0, 1, 0], [], []>} : vector<8x16xf32>, vector<8x16xf32>, vector<8x8xf32> -> vector<8x8xf32>
    %32 = arith.addf %31, %9 : vector<8x8xf32>
    %cst_20 = arith.constant dense<0xFF800000> : vector<8xf32>
    %33 = vector.multi_reduction <maximumf>, %32, %cst_20 [1] : vector<8x8xf32> to vector<8xf32>
    %34 = vector.shape_cast %33 : vector<8xf32> to vector<8x1xf32>
    %35 = vector.broadcast %34 : vector<8x1xf32> to vector<8x8xf32>
    %36 = arith.subf %32, %35 : vector<8x8xf32>
    %37 = math.exp %36 : vector<8x8xf32>
    %cst_21 = arith.constant dense<0.000000e+00> : vector<8xf32>
    %38 = vector.multi_reduction <add>, %37, %cst_21 [1] : vector<8x8xf32> to vector<8xf32>
    %39 = vector.shape_cast %38 : vector<8xf32> to vector<8x1xf32>
    %40 = tpu.reciprocal %39 : vector<8x1xf32> -> vector<8x1xf32>
    %41 = vector.broadcast %40 : vector<8x1xf32> to vector<8x8xf32>
    %42 = arith.mulf %37, %41 : vector<8x8xf32>
    %c0_22 = arith.constant 0 : index
    %c1 = arith.constant 1 : index
    %c0_23 = arith.constant 0 : index
    %c0_24 = arith.constant 0 : index
    %43 = vector.load %arg7[%c0_22, %c1, %c0_23, %c0_24] : memref<1x4x8x8xf32, #tpu.memory_space<vmem>>, vector<1x1x8x8xf32>
    %44 = vector.shape_cast %43 : vector<1x1x8x8xf32> to vector<8x8xf32>
    %45 = vector.shape_cast %42 : vector<8x8xf32> to vector<1x1x8x8xf32>
    tpu.vector_store %arg7[%c0_22, %c1, %c0_23, %c0_24], %45 {strides = array<i32>} : memref<1x4x8x8xf32, #tpu.memory_space<vmem>>, vector<1x1x8x8xf32>,
    %46 = vector.extract_strided_slice %7 {offsets = [0, 16], sizes = [8, 16], strides = [1, 1]} : vector<8x64xf32> to vector<8x16xf32>
    %cst_25 = arith.constant dense<0.000000e+00> : vector<8x16xf32>
    %47 = tpu.matmul %42, %46, %cst_25 {dimension_numbers = #tpu.dot_dimension_numbers<[1], [0], [0], [1], [0, 0, 1, 1], [], []>} : vector<8x8xf32>, vector<8x16xf32>, vector<8x16xf32> -> vector<8x16xf32>
    %48 = vector.extract_strided_slice %3 {offsets = [0, 32], sizes = [8, 16], strides = [1, 1]} : vector<8x64xf32> to vector<8x16xf32>
    %49 = vector.extract_strided_slice %5 {offsets = [0, 32], sizes = [8, 16], strides = [1, 1]} : vector<8x64xf32> to vector<8x16xf32>
    %cst_26 = arith.constant dense<0.000000e+00> : vector<8x8xf32>
    %50 = tpu.matmul %48, %49, %cst_26 {dimension_numbers = #tpu.dot_dimension_numbers<[1], [1], [0], [0], [0, 0, 1, 0], [], []>} : vector<8x16xf32>, vector<8x16xf32>, vector<8x8xf32> -> vector<8x8xf32>
    %51 = arith.addf %50, %9 : vector<8x8xf32>
    %cst_27 = arith.constant dense<0xFF800000> : vector<8xf32>
    %52 = vector.multi_reduction <maximumf>, %51, %cst_27 [1] : vector<8x8xf32> to vector<8xf32>
    %53 = vector.shape_cast %52 : vector<8xf32> to vector<8x1xf32>
    %54 = vector.broadcast %53 : vector<8x1xf32> to vector<8x8xf32>
    %55 = arith.subf %51, %54 : vector<8x8xf32>
    %56 = math.exp %55 : vector<8x8xf32>
    %cst_28 = arith.constant dense<0.000000e+00> : vector<8xf32>
    %57 = vector.multi_reduction <add>, %56, %cst_28 [1] : vector<8x8xf32> to vector<8xf32>
    %58 = vector.shape_cast %57 : vector<8xf32> to vector<8x1xf32>
    %59 = tpu.reciprocal %58 : vector<8x1xf32> -> vector<8x1xf32>
    %60 = vector.broadcast %59 : vector<8x1xf32> to vector<8x8xf32>
    %61 = arith.mulf %56, %60 : vector<8x8xf32>
    %c0_29 = arith.constant 0 : index
    %c2 = arith.constant 2 : index
    %c0_30 = arith.constant 0 : index
    %c0_31 = arith.constant 0 : index
    %62 = vector.load %arg7[%c0_29, %c2, %c0_30, %c0_31] : memref<1x4x8x8xf32, #tpu.memory_space<vmem>>, vector<1x1x8x8xf32>
    %63 = vector.shape_cast %62 : vector<1x1x8x8xf32> to vector<8x8xf32>
    %64 = vector.shape_cast %61 : vector<8x8xf32> to vector<1x1x8x8xf32>
    tpu.vector_store %arg7[%c0_29, %c2, %c0_30, %c0_31], %64 {strides = array<i32>} : memref<1x4x8x8xf32, #tpu.memory_space<vmem>>, vector<1x1x8x8xf32>,
    %65 = vector.extract_strided_slice %7 {offsets = [0, 32], sizes = [8, 16], strides = [1, 1]} : vector<8x64xf32> to vector<8x16xf32>
    %cst_32 = arith.constant dense<0.000000e+00> : vector<8x16xf32>
    %66 = tpu.matmul %61, %65, %cst_32 {dimension_numbers = #tpu.dot_dimension_numbers<[1], [0], [0], [1], [0, 0, 1, 1], [], []>} : vector<8x8xf32>, vector<8x16xf32>, vector<8x16xf32> -> vector<8x16xf32>
    %67 = vector.extract_strided_slice %3 {offsets = [0, 48], sizes = [8, 16], strides = [1, 1]} : vector<8x64xf32> to vector<8x16xf32>
    %68 = vector.extract_strided_slice %5 {offsets = [0, 48], sizes = [8, 16], strides = [1, 1]} : vector<8x64xf32> to vector<8x16xf32>
    %cst_33 = arith.constant dense<0.000000e+00> : vector<8x8xf32>
    %69 = tpu.matmul %67, %68, %cst_33 {dimension_numbers = #tpu.dot_dimension_numbers<[1], [1], [0], [0], [0, 0, 1, 0], [], []>} : vector<8x16xf32>, vector<8x16xf32>, vector<8x8xf32> -> vector<8x8xf32>
    %70 = arith.addf %69, %9 : vector<8x8xf32>
    %cst_34 = arith.constant dense<0xFF800000> : vector<8xf32>
    %71 = vector.multi_reduction <maximumf>, %70, %cst_34 [1] : vector<8x8xf32> to vector<8xf32>
    %72 = vector.shape_cast %71 : vector<8xf32> to vector<8x1xf32>
    %73 = vector.broadcast %72 : vector<8x1xf32> to vector<8x8xf32>
    %74 = arith.subf %70, %73 : vector<8x8xf32>
    %75 = math.exp %74 : vector<8x8xf32>
    %cst_35 = arith.constant dense<0.000000e+00> : vector<8xf32>
    %76 = vector.multi_reduction <add>, %75, %cst_35 [1] : vector<8x8xf32> to vector<8xf32>
    %77 = vector.shape_cast %76 : vector<8xf32> to vector<8x1xf32>
    %78 = tpu.reciprocal %77 : vector<8x1xf32> -> vector<8x1xf32>
    %79 = vector.broadcast %78 : vector<8x1xf32> to vector<8x8xf32>
    %80 = arith.mulf %75, %79 : vector<8x8xf32>
    %c0_36 = arith.constant 0 : index
    %c3 = arith.constant 3 : index
    %c0_37 = arith.constant 0 : index
    %c0_38 = arith.constant 0 : index
    %81 = vector.load %arg7[%c0_36, %c3, %c0_37, %c0_38] : memref<1x4x8x8xf32, #tpu.memory_space<vmem>>, vector<1x1x8x8xf32>
    %82 = vector.shape_cast %81 : vector<1x1x8x8xf32> to vector<8x8xf32>
    %83 = vector.shape_cast %80 : vector<8x8xf32> to vector<1x1x8x8xf32>
    tpu.vector_store %arg7[%c0_36, %c3, %c0_37, %c0_38], %83 {strides = array<i32>} : memref<1x4x8x8xf32, #tpu.memory_space<vmem>>, vector<1x1x8x8xf32>,
    %84 = vector.extract_strided_slice %7 {offsets = [0, 48], sizes = [8, 16], strides = [1, 1]} : vector<8x64xf32> to vector<8x16xf32>
    %cst_39 = arith.constant dense<0.000000e+00> : vector<8x16xf32>
    %85 = tpu.matmul %80, %84, %cst_39 {dimension_numbers = #tpu.dot_dimension_numbers<[1], [0], [0], [1], [0, 0, 1, 1], [], []>} : vector<8x8xf32>, vector<8x16xf32>, vector<8x16xf32> -> vector<8x16xf32>
    %86 = tpu.concatenate %28, %47, %66, %85 in 1 : vector<8x16xf32>, vector<8x16xf32>, vector<8x16xf32>, vector<8x16xf32> -> vector<8x64xf32>
    %c0_40 = arith.constant 0 : index
    %c0_41 = arith.constant 0 : index
    %c0_42 = arith.constant 0 : index
    %87 = vector.load %arg6[%c0_40, %c0_41, %c0_42] : memref<1x8x64xf32, #tpu.memory_space<vmem>>, vector<1x8x64xf32>
    %88 = vector.shape_cast %87 : vector<1x8x64xf32> to vector<8x64xf32>
    %89 = vector.shape_cast %86 : vector<8x64xf32> to vector<1x8x64xf32>
    tpu.vector_store %arg6[%c0_40, %c0_41, %c0_42], %89 {strides = array<i32>} : memref<1x8x64xf32, #tpu.memory_space<vmem>>, vector<1x8x64xf32>,
    return
  }
  func.func @transform_0(%arg0: i32, %arg1: i32) -> (i32, i32, i32) {
    %c0_i32 = arith.constant 0 : i32
    %c0_i32_0 = arith.constant 0 : i32
    return %arg0, %arg1, %c0_i32 : i32, i32, i32
  }
  func.func @transform_1(%arg0: i32, %arg1: i32) -> (i32, i32, i32) {
    %c0_i32 = arith.constant 0 : i32
    %c0_i32_0 = arith.constant 0 : i32
    %c0_i32_1 = arith.constant 0 : i32
    return %arg0, %c0_i32, %c0_i32_0 : i32, i32, i32
  }
  func.func @transform_2(%arg0: i32, %arg1: i32) -> (i32, i32, i32) {
    %c0_i32 = arith.constant 0 : i32
    %c0_i32_0 = arith.constant 0 : i32
    %c0_i32_1 = arith.constant 0 : i32
    return %arg0, %c0_i32, %c0_i32_0 : i32, i32, i32
  }
  func.func @transform_3(%arg0: i32, %arg1: i32) -> (i32, i32, i32) {
    %c0_i32 = arith.constant 0 : i32
    %c0_i32_0 = arith.constant 0 : i32
    return %arg0, %arg1, %c0_i32 : i32, i32, i32
  }
  func.func @transform_4(%arg0: i32, %arg1: i32) -> (i32, i32, i32) {
    %c0_i32 = arith.constant 0 : i32
    %c0_i32_0 = arith.constant 0 : i32
    return %arg0, %arg1, %c0_i32 : i32, i32, i32
  }
  func.func @transform_5(%arg0: i32, %arg1: i32) -> (i32, i32, i32, i32) {
    %c0_i32 = arith.constant 0 : i32
    %c0_i32_0 = arith.constant 0 : i32
    %c0_i32_1 = arith.constant 0 : i32
    return %arg0, %c0_i32, %arg1, %c0_i32_0 : i32, i32, i32, i32
  }
}

</mosaic_0001>

<bundles_post_ra>
// kernel: tpu_custom_call.1
= control target key start
LH: loop header
LB: loop body
LE: loop exit
PB: predicated region body
PF: predicated region fallthrough
CT: control target
= control target key end

     0   :  { %s2194_s0 = inlined_call_operand.hbm [shape: f32[2,8,64], index: 0, kind: input, shape index: {}]   ;;  %s2195_s1 = inlined_call_operand.hbm [shape: f32[2,8,64], index: 1, kind: input, shape index: {}]   ;;  %s2196_s2 = inlined_call_operand.hbm [shape: f32[2,8,64], index: 2, kind: input, shape index: {}]   ;;  %s2197_s3 = inlined_call_operand.hbm [shape: f32[2,8,8], index: 3, kind: input, shape index: {}]   ;;  %s2198_s4 = inlined_call_operand.hbm [shape: f32[2,8,64], index: 4, kind: output, shape index: {0}]   ;;  %s2199_s5 = inlined_call_operand.hbm [shape: f32[2,4,8,8], index: 5, kind: output, shape index: {1}]  }
   0x1   :  { %2210 = sst [smem:[#allocation24_spill]] %s2195_s1 }
   0x2   :  { %11 = vsyncpa [#allocation3], 0 }
   0x3   :  { %13 = vsyncpa [#allocation3 + $0x1], 0 }
   0x4   :  { %14 = vsyncpa [#allocation6], 0 }
   0x5   :  { %16 = vsyncpa [#allocation6 + $0x1], 0 }
   0x6   :  { %17 = vsyncpa [#allocation9], 0 }
   0x7   :  { %19 = vsyncpa [#allocation9 + $0x1], 0 }
   0x8   :  { %20 = vsyncpa [#allocation4], 0 }
   0x9   :  { %22 = vsyncpa [#allocation4 + $0x1], 0 }
   0xa   :  { %23 = vsyncpa [#allocation12], 0 }
   0xb   :  { %25 = vsyncpa [#allocation12 + $0x1], 0  ;;  %s1784_s18 = smov 0   ;;  %s1786_s19 = smov 0  }
   0xc   :  { %s1788_s20 = smov 0   ;;  %s1790_s21 = smov 0  }
   0xd   :  { %s1792_s22 = smov 0   ;;  %s1794_s23 = smov 0  }
   0xe LB: > { %2211 = sst [smem:[#allocation18_spill]] %s1724_s20  ;;  %s1815_s24 = sadd.s32 4294967295, %s1736_s23   ;;  %s1736_s23 = sphi %s1794_s23, %s31_s23   ;;  %s1732_s22 = sphi %s1792_s22, %s2239_s22   ;;  %s1728_s21 = sphi %s1790_s21, %s2238_s21   ;;  %s1724_s20 = sphi %s1788_s20, %s2237_s20   ;;  %s1720_s19 = sphi %s1786_s19, %s2241_s19   ;;  %s1716_s18 = sphi %s1784_s18, %s2240_s18  }
   0xf   : > { %2212 = sst [smem:[#allocation19_spill]] %s1732_s22  ;;  %s1289_s25 = sadd.s32 4294967294, %s1736_s23  }
  0x10   : > { %2213 = sst [smem:[#allocation20_spill]] %s1736_s23  ;;  %s43_s26 = sadd.s32 1, %s1732_s22 }
  0x11   : > { %s52_s27 = sadd.s32 1, %s1724_s20  ;;  %p45_p0 = scmp.ge.s32.totalorder %s43_s26, 2 }
  0x12   : > { %p59_p1 = scmp.ne.s32.totalorder %s1724_s20, %s1720_s19  ;;  %p60_p2 = scmp.eq.s32.totalorder %s1736_s23, 0 }
  0x13   : > { %p65_p3 = scmp.ne.s32.totalorder %s1720_s19, %s1716_s18  ;;  %s2243_s26 = smov (%p45_p0, %s43_s26), 0 }
  0x14   : > { %2214 = sst [smem:[#allocation21_spill]] %s2243_s26  ;;  %p1827_p4 = por %p60_p2, %p59_p1 }
  0x15   : > { %p66_p5 = scmp.eq.s32.totalorder %s1815_s24, 0  ;;  %s47_s29 = ssub.s32 %s1732_s22, %s2243_s26 }
  0x16   : > { %p171_p6 = scmp.eq.s32.totalorder %s1815_s24, 1  ;;  %p50_p7 = scmp.eq.s32.totalorder %s47_s29, 0 }
  0x17   : > { %p1835_p8 = por %p66_p5, %p65_p3  ;;  %p177_p10 = scmp.eq.s32.totalorder %s1289_s25, 1 }
  0x18   : > { %p1839_p9 = por %p171_p6, %p59_p1  ;;  %p1418_p13 = scmp.lt.s32.totalorder %s1736_s23, 2 }
  0x19   : > { %s2216_s30 = scalar_select %p1835_p8, 1, 0 }
  0x1a   : > { %s2217_s6 = scalar_select %p1839_p9, 1, 0 }
  0x1b   : > { %s1844_s7 = scalar_select %p50_p7, %s1724_s20, %s52_s27  }
  0x1c   : > { %p1846_p11 = por %p177_p10, %p65_p3  ;;  %s1853_s9 = sand.u32 1, %s1724_s20  }
  0x1d   : > { %2218 = sst [smem:[#allocation22_spill]] %s1844_s7  ;;  %s1856_s10 = sshll.u32 %s1853_s9, 3 }
  0x1e   : > { %s2219_s8 = scalar_select %p1846_p11, 1, 0 }
  0x1f   : > { %s1859_s11 = sshll.u32 %s1732_s22, 7  ;;  %p1863_p0 = pnand %p1418_p13, %p1827_p4 }
  0x20   : > { %2220 = sst [smem:[#allocation23_spill]] %s2219_s8  ;;  %s244_s13 = sand.u32 1, %s1736_s23  }
  0x21   : > { %s2221_s12 = scalar_select %p1863_p0, 1, 0 }
  0x22   : > { %s2222_s1 = sld [smem:[#allocation24_spill]]  ;;  %s248_s17 = scalar_lea.vmem [#allocation5], %s1856_s10 }
  0x23   : > { %s255_s25 = sshll.u32 %s248_s17, 4  ;;  %s1879_s27 = scalar_lea.sflag [#allocation6], %s244_s13  ;;  %s1876_s25 = int_to_ptr.vmem [resolvable:$true] %s255_s25 }
  0x24   : > { %p1885_p4 = pneg %p1863_p0 }
  0x28   : > { %s1872_s16 = scalar_lea.hbm %s2222_s1, %s1859_s11  ;;  %s1499_s17 = scalar_lea.hbm %s2222_s1, 256 }
  0x29   : > { %s1494_s28 = scalar_lea.hbm %s1872_s16, 128  ;;  %p1500_p7 = scmp.lt.u32.totalorder %s1872_s16, %s2222_s1 }
  0x2a   : > { %p1495_p3 = scmp.ne.s32.totalorder %s1872_s16, %s1494_s28  ;;  %p1501_p10 = scmp.lt.u32.totalorder %s1499_s17, %s1494_s28 }
  0x2b   : > { %p1503_p12 = scmp.lt.u32.totalorder %s1494_s28, %s1872_s16 }
  0x2c   : > { %p1497_p5 = pnand %p1885_p4, %p1495_p3  ;;  %p1502_p13 = por %p1501_p10, %p1500_p7 }
  0x2e   : > { %p1498_p6 = pneg %p1497_p5  ;;  %p1504_p1 = por %p1503_p12, %p1502_p13 }
  0x30   : > { %p1505_p2 = pnand %p1504_p1, %p1498_p6 }
  0x32   : > { %1508 = shalt.err (!%p1505_p2)
}
  0x33   : > { %s1509_s13 = scalar_lea.vmem %s1876_s25, 128  ;;  %s1738_s14 = smov [#allocation5]  }
  0x34   : > { %p1510_p3 = scmp.ne.s32.totalorder %s1876_s25, %s1509_s13  ;;  %s1514_s15 = sshll.u32 %s1738_s14, 4  ;;  %s1515_s15 = int_to_ptr.vmem [resolvable:$false] %s1514_s15 }
  0x35   : > { %s1516_s22 = scalar_lea.vmem %s1515_s15, 256  ;;  %p1517_p9 = scmp.lt.s32.totalorder %s1876_s25, %s1515_s15 }
  0x36   : > { %p1512_p5 = pnand %p1510_p3, %p1885_p4  ;;  %p1518_p8 = scmp.lt.s32.totalorder %s1516_s22, %s1509_s13 }
  0x38   : > { %p1513_p11 = pneg %p1512_p5  ;;  %p1519_p7 = por %p1518_p8, %p1517_p9 }
  0x3a   : > { %p1520_p10 = pnand %p1519_p7, %p1513_p11 }
  0x3c   : > { %1523 = shalt.err (!%p1520_p10)
}
  0x3d   : > { %1404 = dma.hbm_to_vmem [thread:$0]  (!%p1863_p0), %s1872_s16, 128, %s1876_s25, %s1879_s27  }
  0x3e   : > { %p2224_p12 = scmp.lt.s32.totalorder %s1736_s23, 3  ;;  %p2225_p1 = scmp.ge.s32.totalorder %s1736_s23, 1 }
  0x3f   : > { %s1921_s13 = scalar_lea.hbm %s2194_s0, %s1859_s11  ;;  %s229_s14 = scalar_lea.vmem [#allocation2], %s1856_s10 }
  0x40   : > { %p1913_p2 = pnand %p2225_p1, %p2224_p12  ;;  %s237_s15 = sshll.u32 %s229_s14, 4  ;;  %s1924_s15 = int_to_ptr.vmem [resolvable:$true] %s237_s15 }
  0x41   : > { %s1930_s22 = scalar_lea.hbm %s2196_s2, %s1859_s11  ;;  %s226_s1 = scalar_lea.sflag [#allocation3], %s1853_s9 }
  0x42   : > { %s2226_s26 = scalar_select %p1913_p2, 1, 0 }
  0x43   : > { %s1524_s7 = scalar_lea.hbm %s1921_s13, 128  ;;  %s1529_s20 = scalar_lea.hbm %s2194_s0, 256 }
  0x44   : > { %p1525_p8 = scmp.ne.s32.totalorder %s1921_s13, %s1524_s7  ;;  %p1530_p6 = scmp.lt.u32.totalorder %s1921_s13, %s2194_s0 }
  0x45   : > { %p1531_p13 = scmp.lt.u32.totalorder %s1529_s20, %s1524_s7  ;;  %p1533_p5 = scmp.lt.u32.totalorder %s1524_s7, %s1921_s13 }
  0x46   : > { %p1527_p9 = pnand %p1525_p8, %p1885_p4 }
  0x47   : > { %p1532_p3 = por %p1531_p13, %p1530_p6 }
  0x48   : > { %p1528_p11 = pneg %p1527_p9 }
  0x49   : > { %p1534_p7 = por %p1533_p5, %p1532_p3 }
  0x4b   : > { %p1535_p10 = pnand %p1534_p7, %p1528_p11 }
  0x4d   : > { %1538 = shalt.err (!%p1535_p10)
}
  0x4e   : > { %s1539_s14 = scalar_lea.vmem %s1924_s15, 128  ;;  %s1739_s16 = smov [#allocation2]  }
  0x4f   : > { %p1540_p12 = scmp.ne.s32.totalorder %s1924_s15, %s1539_s14  ;;  %s1544_s25 = sshll.u32 %s1739_s16, 4  ;;  %s1545_s25 = int_to_ptr.vmem [resolvable:$false] %s1544_s25 }
  0x50   : > { %s1546_s23 = scalar_lea.vmem %s1545_s25, 256  ;;  %p1547_p9 = scmp.lt.s32.totalorder %s1924_s15, %s1545_s25 }
  0x51   : > { %p1542_p1 = pnand %p1540_p12, %p1885_p4  ;;  %p1548_p2 = scmp.lt.s32.totalorder %s1546_s23, %s1539_s14 }
  0x53   : > { %p1543_p8 = pneg %p1542_p1  ;;  %p1549_p6 = por %p1548_p2, %p1547_p9 }
  0x55   : > { %p1550_p13 = pnand %p1549_p6, %p1543_p8 }
  0x57   : > { %1553 = shalt.err (!%p1550_p13)
}
  0x58   : > { %1401 = dma.hbm_to_vmem [thread:$0]  (!%p1863_p0), %s1921_s13, 128, %s1924_s15, %s226_s1  }
  0x59   : > { %s266_s20 = scalar_lea.vmem [#allocation7], %s1856_s10  ;;  %s1554_s8 = scalar_lea.hbm %s1930_s22, 128 }
  0x5a   : > { %s273_s7 = sshll.u32 %s266_s20, 4  ;;  %p1555_p11 = scmp.ne.s32.totalorder %s1930_s22, %s1554_s8  ;;  %s274_s7 = int_to_ptr.vmem [resolvable:$true] %s273_s7 }
  0x5b   : > { %s1559_s14 = scalar_lea.hbm %s2196_s2, 256  ;;  %p1560_p5 = scmp.lt.u32.totalorder %s1930_s22, %s2196_s2 }
  0x5c   : > { %p1557_p2 = pnand %p1555_p11, %p1885_p4  ;;  %p1561_p7 = scmp.lt.u32.totalorder %s1559_s14, %s1554_s8 }
  0x5d   : > { %p1563_p12 = scmp.lt.u32.totalorder %s1554_s8, %s1930_s22 }
  0x5e   : > { %p1558_p3 = pneg %p1557_p2  ;;  %p1562_p10 = por %p1561_p7, %p1560_p5 }
  0x60   : > { %p1564_p1 = por %p1563_p12, %p1562_p10 }
  0x62   : > { %p1565_p8 = pnand %p1564_p1, %p1558_p3 }
  0x64   : > { %1568 = shalt.err (!%p1565_p8)
}
  0x65   : > { %s1569_s1 = scalar_lea.vmem %s274_s7, 128  ;;  %s1740_s13 = smov [#allocation7]  }
  0x66   : > { %p1570_p9 = scmp.ne.s32.totalorder %s274_s7, %s1569_s1  ;;  %s1574_s15 = sshll.u32 %s1740_s13, 4  ;;  %s1575_s15 = int_to_ptr.vmem [resolvable:$false] %s1574_s15 }
  0x67   : > { %s1576_s23 = scalar_lea.vmem %s1575_s15, 256  ;;  %p1577_p11 = scmp.lt.s32.totalorder %s274_s7, %s1575_s15 }
  0x68   : > { %p1572_p6 = pnand %p1570_p9, %p1885_p4  ;;  %p1578_p2 = scmp.lt.s32.totalorder %s1576_s23, %s1569_s1 }
  0x6a   : > { %p1573_p13 = pneg %p1572_p6  ;;  %p1579_p0 = por %p1578_p2, %p1577_p11 }
  0x6c   : > { %p1580_p5 = pnand %p1579_p0, %p1573_p13 }
  0x6e   : > { %1583 = shalt.err (!%p1580_p5)
}
  0x6f   : > { %p2227_p7 = scmp.ne.s32.totalorder %s2221_s12, 0  ;;  %s1977_s28 = scalar_lea.hbm %s2197_s3, %s1859_s11 }
  0x70   : > { %s284_s17 = scalar_lea.vmem [#allocation8], %s1856_s10  ;;  %s281_s16 = scalar_lea.sflag [#allocation9], %s1853_s9 }
  0x71   : > { %1407 = dma.hbm_to_vmem [thread:$0]  (!%p2227_p7), %s1930_s22, 128, %s274_s7, %s1879_s27  }
  0x72   : > { %s292_s14 = sshll.u32 %s284_s17, 4  ;;  %s1584_s25 = scalar_lea.hbm %s1977_s28, 128  ;;  %s293_s14 = int_to_ptr.vmem [resolvable:$true] %s292_s14 }
  0x73   : > { %p1585_p0 = scmp.ne.s32.totalorder %s1977_s28, %s1584_s25  ;;  %s1589_s22 = scalar_lea.hbm %s2197_s3, 256 }
  0x74   : > { %p1590_p12 = scmp.lt.u32.totalorder %s1977_s28, %s2197_s3  ;;  %p1591_p1 = scmp.lt.u32.totalorder %s1589_s22, %s1584_s25 }
  0x75   : > { %p1587_p3 = pnand %p1585_p0, %p1885_p4  ;;  %p1593_p9 = scmp.lt.u32.totalorder %s1584_s25, %s1977_s28 }
  0x76   : > { %p1592_p8 = por %p1591_p1, %p1590_p12 }
  0x77   : > { %p1588_p10 = pneg %p1587_p3 }
  0x78   : > { %p1594_p6 = por %p1593_p9, %p1592_p8 }
  0x7a   : > { %p1595_p13 = pnand %p1594_p6, %p1588_p10 }
  0x7c   : > { %1598 = shalt.err (!%p1595_p13)
}
  0x7d   : > { %s1599_s9 = scalar_lea.vmem %s293_s14, 128  ;;  %s1741_s10 = smov [#allocation8]  }
  0x7e   : > { %p1600_p11 = scmp.ne.s32.totalorder %s293_s14, %s1599_s9  ;;  %s1604_s13 = sshll.u32 %s1741_s10, 4  ;;  %s1605_s13 = int_to_ptr.vmem [resolvable:$false] %s1604_s13 }
  0x7f   : > { %s1606_s15 = scalar_lea.vmem %s1605_s13, 256  ;;  %p1607_p0 = scmp.lt.s32.totalorder %s293_s14, %s1605_s13 }
  0x80   : > { %p1602_p2 = pnand %p1600_p11, %p1885_p4  ;;  %p1608_p3 = scmp.lt.s32.totalorder %s1606_s15, %s1599_s9 }
  0x82   : > { %p1603_p5 = pneg %p1602_p2  ;;  %p1609_p7 = por %p1608_p3, %p1607_p0 }
  0x84   : > { %p1610_p1 = pnand %p1609_p7, %p1603_p5 }
  0x86   : > { %1613 = shalt.err (!%p1610_p1)
}
  0x87   : > { %p2228_p12 = scmp.ne.s32.totalorder %s2221_s12, 0  ;;  %p2229_p10 = scmp.ne.s32.totalorder %s2226_s26, 0 }
  0x88   : > { %s2001_s29 = sand.u32 (!%p2229_p10), 1, %s1720_s19   ;;  %p2230_p4 = scmp.ne.s32.totalorder (!%p2229_p10), %s2216_s30, 0 }
  0x89   : > { %1410 = dma.hbm_to_vmem [thread:$0]  (!%p2228_p12), %s1977_s28, 128, %s293_s14, %s281_s16  }
  0x8a   : > { %301 = sbr.rel (%p2229_p10) target bundleno = 1613 (0x64d), region = 36  ;;  %s2004_s23 = sshll.u32 (!%p2229_p10), %s2001_s29, 3 }
  0x8b   : > { %s304_s20 = scalar_lea.sflag (!%p2229_p10), [#allocation3], %s2001_s29  ;;  %s307_s8 = scalar_lea.vmem (!%p2229_p10), [#allocation2], %s2004_s23 }
  0x91   : > { %1695 = dma.done.wait (%p2230_p4), %s304_s20, 128  }
  0x92   : > { %1697 = vsyncadd (%p2230_p4), %s304_s20, 4294967168  ;;  %s312_s12 = sand.u32 1, %s1815_s24   ;;  %s316_s28 = scalar_lea.vmem [#allocation5], %s2004_s23 }
  0x93   : > { %s313_s26 = scalar_lea.sflag [#allocation6], %s312_s12 }
  0x94   : > { %1699 = dma.done.wait (%p2230_p4), %s313_s26, 256  }
  0x95   : > { %1701 = vsyncadd (%p2230_p4), %s313_s26, 4294967040  ;;  %s325_s17 = scalar_lea.vmem [#allocation7], %s2004_s23  ;;  %s331_s14 = scalar_lea.sflag [#allocation9], %s2001_s29 }
  0x96   : > { %s334_s16 = scalar_lea.vmem [#allocation8], %s2004_s23 }
  0x97   : > { %1703 = dma.done.wait (%p2230_p4), %s331_s14, 128  }
  0x98   : > { %1705 = vsyncadd (%p2230_p4), %s331_s14, 4294967168  ;;  %v1742_v0 = vmov 0.0   ;;  %vm1743_vm0 = vmmov 0   ;;  %vm386_vm1 = vcmask 130048   ;;  %v383_v1 = vld [vmem:[%s316_s28] sm:$0xff]  ;;  %v381_v2 = vld [vmem:[%s307_s8] sm:$0xff] }
  0x99   : > { %1346 = vmatprep.subr.mxu0 %v1742_v0  ;;  %1348 = vmatprep.mubr.msk.f32.mxu0 %vm1743_vm0, %v1742_v0  ;;  %v382_v3 = vmul.f32 0.25, %v381_v2  ;;  %v2036_v4 = vld [vmem:[%s334_s16] sm:$0xff]  ;;  %vm463_vm2 = vcmask 64512   ;;  %s1744_s24 = smov 112   ;;  %s1745_s30 = smov 96   ;;  %v2048_v14 = vld [vmem:[%s325_s17] sm:$0xff] }
  0x9a   : > { %1351 = vmatprep.subr.mxu1 %v1742_v0  ;;  %1353 = vmatprep.mubr.msk.f32.mxu1 %vm1743_vm0, %v1742_v0  ;;  %s1746_s25 = smov 80   ;;  %s1306_s1 = sshll.u32 %s2001_s29, 5 }
  0x9b   : > { %1347 = vmatpush3.xpose.msk.msra.mxu0 %vm386_vm1, %v383_v1  ;;  %551 = vrot.lane.b32.xlu1 %v383_v1, %s1744_s24  ;;  %s2054_s27 = scalar_lea.vmem [#allocation11], %s1306_s1  ;;  %s1747_s22 = smov 16  }
  0x9c   : > { %1361 = vmatprep.subr.mxu0 %v1742_v0  ;;  %1352 = vmatpush3.msra.mxu1 %v2048_v14  ;;  %s1748_s7 = smov 32   ;;  %s1329_s11 = sshll.u32 %s1728_s21, 9 }
  0x9d   : > { %1356 = vmatprep.subr.mxu1 %v1742_v0  ;;  %s1104_s9 = sshll.u32 %s2054_s27, 4  ;;  %s2110_s15 = scalar_lea.hbm %s2199_s5, %s1329_s11  ;;  %s2112_s9 = int_to_ptr.vmem [resolvable:$true] %s1104_s9 }
  0x9e   : > { %1349 = vmatmul.mubr.msk.f32.vlgmr.msra.gmra.mrb[0].mxu0 %vm386_vm1, %v382_v3  ;;  %s1076_s20 = scalar_lea.sflag [#allocation12], %s2001_s29  ;;  %s1614_s8 = scalar_lea.vmem %s2112_s9, 512 }
  0x9f   : > { %1363 = vmatprep.mubr.msk.f32.mxu0 %vm1743_vm0, %v1742_v0  ;;  %549 = vrot.lane.b32.xlu1 %v382_v3, %s1744_s24  ;;  %p1615_p7 = scmp.ne.s32.totalorder %s2112_s9, %s1614_s8  ;;  %p2231_p8 = scmp.ne.s32.totalorder %s2217_s6, 0 }
  0xa0   : > { %s1749_s12 = smov [#allocation11]  }
  0xa1   : > { %p1616_p9 = pnand %p1615_p7, %p2231_p8  ;;  %s1618_s26 = sshll.u32 %s1749_s12, 4  ;;  %s1619_s26 = int_to_ptr.vmem [resolvable:$false] %s1618_s26 }
  0xa2   : > { %s1620_s28 = scalar_lea.vmem %s1619_s26, 1024  ;;  %p1621_p13 = scmp.lt.s32.totalorder %s2112_s9, %s1619_s26 }
  0xa3   : > { %717 = vrot.lane.b32.xlu1 %v382_v3, %s1745_s30  ;;  %p1617_p6 = pneg %p1616_p9  ;;  %p1622_p11 = scmp.lt.s32.totalorder %s1620_s28, %s1614_s8 }
  0xa5   : > { %p1623_p2 = por %p1622_p11, %p1621_p13 }
  0xa7   : > { %886 = vrot.lane.b32.xlu1 %v383_v1, %s1746_s25  ;;  %p1624_p5 = pnand %p1623_p2, %p1617_p6 }
  0xab   : > { %884 = vrot.lane.b32.xlu1 %v382_v3, %s1746_s25 }
 0x10d   : > { %v552_v15 = vpop.permute.xlu1 %551 }
 0x111   : > { %v550_v17 = vpop.permute.xlu1 %549 }
 0x115   : > { %v718_v19 = vpop.permute.xlu1 %717 }
 0x119   : > { %v887_v22 = vpop.permute.xlu1 %886 }
 0x11d   : > { %v885_v23 = vpop.permute.xlu1 %884 }
 0x171   : > { %v459_v5 = vpop.f32.mrb[0].mxu0 }
 0x172   : > { %v460_v6 = vadd.f32 %v459_v5, %v2036_v4  ;;  %v1350_v7 = vpop.f32.mrb[1].mxu0 }
 0x174   : > { %v464_v8 = vsel %vm463_vm2, %v460_v6, -inf }
 0x175   : > { %465 = vmax.xlane.f32.xlu0 %v464_v8 }
 0x202   : > { %v466_v9 = vpop.xlane.xlu0 %465 }
 0x203   : > { %v467_v10 = vsub.f32 %v460_v6, %v466_v9 }
 0x205   : > { %v468_v11 = vmul.f32 1.442695, %v467_v10 }
 0x207   : > { %1478 = vpow2.f32 %v468_v11 }
 0x211   : > { %v1479_v12 = vpop.eup %1478 }
 0x212   : > { %v470_v13 = vsel %vm463_vm2, %v1479_v12, 0.0 }
 0x213   : > { %471 = vadd.xlane.f32.xlu0 %v470_v13 }
 0x229   : > { %719 = vrot.lane.b32.xlu0 %v383_v1, %s1745_s30 }
 0x2a0   : > { %v472_v16 = vpop.xlane.xlu0 %471 }
 0x2a1   : > { %1480 = vrcp.f32 %v472_v16 }
 0x2a4   : > { %v720_v21 = vpop.permute.xlu0 %719 }
 0x2ab   : > { %v1481_v18 = vpop.eup %1480 }
 0x2ac   : > { %v474_v20 = vmul.f32 %v1481_v18, %v1479_v12 }
 0x2ae   : > { %475 = vst.msk [vmem:[%s2054_s27] sm:$0xff] %vm463_vm2, %v474_v20  ;;  %1354 = vmatmul.mubr.msk.f32.vlgmr.msra.gmra.mrb[0].mxu1 %vm463_vm2, %v474_v20 }
 0x2af   : > { %1357 = vmatpush3.xpose.msk.msra.mxu1 %vm386_vm1, %v552_v15  ;;  %1358 = vmatprep.mubr.msk.f32.mxu1 %vm1743_vm0, %v1742_v0 }
 0x2b0   : > { %1366 = vmatprep.subr.mxu1 %v1742_v0 }
 0x2b2   : > { %1359 = vmatmul.mubr.msk.f32.vlgmr.msra.gmra.mrb[2].mxu1 %vm386_vm1, %v550_v17 }
 0x2b3   : > { %1367 = vmatpush3.xpose.msk.msra.mxu1 %vm386_vm1, %v720_v21  ;;  %1368 = vmatprep.mubr.msk.f32.mxu1 %vm1743_vm0, %v1742_v0 }
 0x2b4   : > { %1376 = vmatprep.subr.mxu1 %v1742_v0 }
 0x2b6   : > { %1369 = vmatmul.mubr.msk.f32.vlgmr.msra.gmra.mrb[4].mxu1 %vm386_vm1, %v718_v19 }
 0x2b7   : > { %1377 = vmatpush3.xpose.msk.msra.mxu1 %vm386_vm1, %v887_v22  ;;  %1378 = vmatprep.mubr.msk.f32.mxu1 %vm1743_vm0, %v1742_v0 }
 0x2ba   : > { %1379 = vmatmul.mubr.msk.f32.vlgmr.msra.gmra.mrb[6].mxu1 %vm386_vm1, %v885_v23 }
 0x381   : > { %v2073_v24 = vpop.f32.mrb[0].mxu1 }
 0x382   : > { %v1355_v25 = vpop.f32.mrb[1].mxu1 }
 0x385   : > { %v623_v26 = vpop.f32.mrb[2].mxu1 }
 0x386   : > { %v624_v27 = vadd.f32 %v623_v26, %v2036_v4  ;;  %v1360_v28 = vpop.f32.mrb[3].mxu1 }
 0x388   : > { %v627_v29 = vsel %vm463_vm2, %v624_v27, -inf }
 0x389   : > { %628 = vmax.xlane.f32.xlu1 %v627_v29  ;;  %v791_v30 = vpop.f32.mrb[4].mxu1 }
 0x38a   : > { %v792_v31 = vadd.f32 %v791_v30, %v2036_v4  ;;  %v1370_v32 = vpop.f32.mrb[5].mxu1 }
 0x38c   : > { %v795_v33 = vsel %vm463_vm2, %v792_v31, -inf }
 0x38d   : > { %796 = vmax.xlane.f32.xlu0 %v795_v33  ;;  %v958_v34 = vpop.f32.mrb[6].mxu1 }
 0x38e   : > { %v959_v35 = vadd.f32 %v958_v34, %v2036_v4  ;;  %v1380_v36 = vpop.f32.mrb[7].mxu1 }
 0x390   : > { %v962_v37 = vsel %vm463_vm2, %v959_v35, -inf }
 0x391   : > { %963 = vmax.xlane.f32.xlu1 %v962_v37 }
 0x416   : > { %v629_v38 = vpop.xlane.xlu1 %628 }
 0x417   : > { %v630_v39 = vsub.f32 %v624_v27, %v629_v38 }
 0x419   : > { %v631_v40 = vmul.f32 1.442695, %v630_v39 }
 0x41a   : > { %v797_v41 = vpop.xlane.xlu0 %796 }
 0x41b   : > { %1482 = vpow2.f32 %v631_v40  ;;  %v798_v42 = vsub.f32 %v792_v31, %v797_v41 }
 0x41d   : > { %v799_v43 = vmul.f32 1.442695, %v798_v42 }
 0x41e   : > { %v964_v48 = vpop.xlane.xlu1 %963 }
 0x41f   : > { %1484 = vpow2.f32 %v799_v43  ;;  %v965_v49 = vsub.f32 %v959_v35, %v964_v48 }
 0x421   : > { %v966_v50 = vmul.f32 1.442695, %v965_v49 }
 0x423   : > { %1486 = vpow2.f32 %v966_v50 }
 0x425   : > { %v1483_v44 = vpop.eup %1482 }
 0x426   : > { %v633_v45 = vsel %vm463_vm2, %v1483_v44, 0.0 }
 0x427   : > { %634 = vadd.xlane.f32.xlu1 %v633_v45 }
 0x429   : > { %v1485_v46 = vpop.eup %1484 }
 0x42a   : > { %v801_v47 = vsel %vm463_vm2, %v1485_v46, 0.0 }
 0x42b   : > { %802 = vadd.xlane.f32.xlu0 %v801_v47 }
 0x42d   : > { %v1487_v51 = vpop.eup %1486 }
 0x42e   : > { %v968_v52 = vsel %vm463_vm2, %v1487_v51, 0.0 }
 0x438   : > { %808 = vrot.lane.b32.xlu1 %v2048_v14, %s1745_s30 }
 0x441   : > { %641 = vrot.lane.b32.xlu0 %v2048_v14, %s1744_s24 }
 0x45c   : > { %969 = vadd.xlane.f32.xlu1 %v968_v52 }
 0x46d   : > { %975 = vrot.lane.b32.xlu1 %v2048_v14, %s1746_s25 }
 0x4b4   : > { %v635_v53 = vpop.xlane.xlu1 %634 }
 0x4b5   : > { %1488 = vrcp.f32 %v635_v53 }
 0x4b8   : > { %v803_v54 = vpop.xlane.xlu0 %802  ;;  %v809_v58 = vpop.permute.xlu1 %808 }
 0x4b9   : > { %1490 = vrcp.f32 %v803_v54 }
 0x4bc   : > { %v642_v55 = vpop.permute.xlu0 %641 }
 0x4bd   : > { %1362 = vmatpush3.msra.mxu0 %v642_v55 }
 0x4be   : > { %1371 = vmatprep.subr.mxu0 %v1742_v0 }
 0x4bf   : > { %v1489_v56 = vpop.eup %1488 }
 0x4c0   : > { %v637_v57 = vmul.f32 %v1489_v56, %v1483_v44 }
 0x4c2   : > { %1312 = vst.msk [vmem:[%s2054_s27 + $0x8] sm:$0xff] %vm463_vm2, %v637_v57  ;;  %1364 = vmatmul.mubr.msk.f32.vlgmr.msra.gmra.mrb[2].mxu0 %vm463_vm2, %v637_v57 }
 0x4c3   : > { %v1491_v59 = vpop.eup %1490  ;;  %1372 = vmatpush3.msra.mxu0 %v809_v58  ;;  %1373 = vmatprep.mubr.msk.f32.mxu0 %vm1743_vm0, %v1742_v0 }
 0x4c4   : > { %v805_v60 = vmul.f32 %v1491_v59, %v1485_v46  ;;  %1381 = vmatprep.subr.mxu0 %v1742_v0 }
 0x4c6   : > { %1316 = vst.msk [vmem:[%s2054_s27 + $0x10] sm:$0xff] %vm463_vm2, %v805_v60  ;;  %1374 = vmatmul.mubr.msk.f32.vlgmr.msra.gmra.mrb[4].mxu0 %vm463_vm2, %v805_v60 }
 0x4c7   : > { %1383 = vmatprep.mubr.msk.f32.mxu0 %vm1743_vm0, %v1742_v0 }
 0x4e9   : > { %v970_v61 = vpop.xlane.xlu1 %969 }
 0x4ea   : > { %1492 = vrcp.f32 %v970_v61 }
 0x4ed   : > { %v976_v62 = vpop.permute.xlu1 %975 }
 0x4ee   : > { %1382 = vmatpush3.msra.mxu0 %v976_v62 }
 0x4f4   : > { %v1493_v63 = vpop.eup %1492 }
 0x4f5   : > { %v972_v1 = vmul.f32 %v1493_v63, %v1487_v51 }
 0x4f7   : > { %1320 = vst.msk [vmem:[%s2054_s27 + $0x18] sm:$0xff] %vm463_vm2, %v972_v1  ;;  %1384 = vmatmul.mubr.msk.f32.vlgmr.msra.gmra.mrb[6].mxu0 %vm463_vm2, %v972_v1 }
 0x595   : > { %v713_v2 = vpop.f32.mrb[2].mxu0 }
 0x596   : > { %1052 = vrot.lane.b32.xlu0 %v713_v2, %s1747_s22  ;;  %v1365_v3 = vpop.f32.mrb[3].mxu0 }
 0x599   : > { %v880_v4 = vpop.f32.mrb[4].mxu0 }
 0x59a   : > { %1056 = vrot.lane.b32.xlu1 %v880_v4, %s1748_s7  ;;  %v1375_v0 = vpop.f32.mrb[5].mxu0 }
 0x59b   : > { %1627 = shalt.err (!%p1624_p5)
}
 0x59c   : > { %s1628_s17 = scalar_lea.hbm %s2110_s15, 512  ;;  %s1632_s24 = scalar_lea.hbm %s2199_s5, 1024 }
 0x59d   : > { %p1629_p0 = scmp.ne.s32.totalorder %s2110_s15, %s1628_s17  ;;  %p1633_p12 = scmp.lt.u32.totalorder %s2110_s15, %s2199_s5 }
 0x59e   : > { %p1634_p10 = scmp.lt.u32.totalorder %s1632_s24, %s1628_s17  ;;  %p1636_p7 = scmp.lt.u32.totalorder %s1628_s17, %s2110_s15 }
 0x59f   : > { %p1630_p3 = pnand %p1629_p0, %p2231_p8 }
 0x5a0   : > { %p1635_p4 = por %p1634_p10, %p1633_p12 }
 0x5a1   : > { %p1631_p1 = pneg %p1630_p3 }
 0x5a2   : > { %p1637_p9 = por %p1636_p7, %p1635_p4 }
 0x5a4   : > { %p1638_p6 = pnand %p1637_p9, %p1631_p1 }
 0x5a6   : > { %1641 = shalt.err (!%p1638_p6)
}
 0x5a7   : > { %s1750_s1 = smov 128   ;;  %s1751_s27 = smov 8   ;;  %vm1064_vm3 = vcmask 261120   ;;  %vm1066_vm4 = vcmask 392192   ;;  %vm1068_vm5 = vcmask 523264  }
 0x5a8   : > { %1395 = dma.vmem_to_hbm [thread:$0]  (%p2231_p8), %s2112_s9, 512, %s2110_s15, %s1076_s20, %s1750_s1, %s1750_s1, %s1751_s27  }
 0x5a9   : > { %s1752_s22 = smov 48   ;;  %s1324_s7 = sshll.u32 %s1728_s21, 7 }
 0x5aa   : > { %s373_s11 = scalar_lea.vmem [#allocation10], %s2004_s23  ;;  %s2145_s15 = scalar_lea.hbm %s2198_s4, %s1324_s7 }
 0x5ab   : > { %s1090_s10 = sshll.u32 %s373_s11, 4  ;;  %s1071_s21 = scalar_lea.sflag [#allocation4], %s2001_s29  ;;  %s2147_s10 = int_to_ptr.vmem [resolvable:$true] %s1090_s10 }
 0x5ac   : > { %s1642_s23 = scalar_lea.vmem %s2147_s10, 128  ;;  %s1753_s20 = smov [#allocation10]  }
 0x5ad   : > { %p1643_p13 = scmp.ne.s32.totalorder %s2147_s10, %s1642_s23  ;;  %s1646_s8 = sshll.u32 %s1753_s20, 4  ;;  %s1647_s8 = int_to_ptr.vmem [resolvable:$false] %s1646_s8 }
 0x5ae   : > { %s1648_s12 = scalar_lea.vmem %s1647_s8, 256  ;;  %p1649_p5 = scmp.lt.s32.totalorder %s2147_s10, %s1647_s8 }
 0x5af   : > { %p1644_p11 = pnand %p1643_p13, %p2231_p8  ;;  %p1650_p0 = scmp.lt.s32.totalorder %s1648_s12, %s1642_s23 }
 0x5b1   : > { %p1645_p2 = pneg %p1644_p11  ;;  %p1651_p3 = por %p1650_p0, %p1649_p5 }
 0x5b3   : > { %p1652_p1 = pnand %p1651_p3, %p1645_p2 }
 0x5ca   : > { %v1047_v5 = vpop.f32.mrb[6].mxu0 }
 0x5cb   : > { %1060 = vrot.lane.b32.xlu0 %v1047_v5, %s1752_s22  ;;  %v1385_v6 = vpop.f32.mrb[7].mxu0 }
 0x608   : > { %v1053_v7 = vpop.permute.xlu0 %1052 }
 0x609   : > { %v1063_v9 = vsel %vm386_vm1, %v2073_v24, %v1053_v7 }
 0x60c   : > { %v1057_v8 = vpop.permute.xlu1 %1056 }
 0x60d   : > { %v1065_v10 = vsel %vm1064_vm3, %v1063_v9, %v1057_v8 }
 0x63d   : > { %v1061_v11 = vpop.permute.xlu0 %1060 }
 0x63e   : > { %v1067_v12 = vsel %vm1066_vm4, %v1065_v10, %v1061_v11 }
 0x63f   : > { %1069 = vst.msk [vmem:[%s373_s11] sm:$0xff] %vm1068_vm5, %v1067_v12 }
 0x640   : > { %1655 = shalt.err (!%p1652_p1)
}
 0x641   : > { %s1656_s29 = scalar_lea.hbm %s2145_s15, 128  ;;  %s1660_s17 = scalar_lea.hbm %s2198_s4, 256 }
 0x642   : > { %p1657_p12 = scmp.ne.s32.totalorder %s2145_s15, %s1656_s29  ;;  %p1661_p7 = scmp.lt.u32.totalorder %s2145_s15, %s2198_s4 }
 0x643   : > { %p1662_p9 = scmp.lt.u32.totalorder %s1660_s17, %s1656_s29  ;;  %p1664_p13 = scmp.lt.u32.totalorder %s1656_s29, %s2145_s15 }
 0x644   : > { %p1658_p10 = pnand %p1657_p12, %p2231_p8 }
 0x645   : > { %p1663_p6 = por %p1662_p9, %p1661_p7 }
 0x646   : > { %p1659_p4 = pneg %p1658_p10 }
 0x647   : > { %p1665_p11 = por %p1664_p13, %p1663_p6 }
 0x649   : > { %p1666_p2 = pnand %p1665_p11, %p1659_p4 }
 0x64b   : > { %1669 = shalt.err (!%p1666_p2)
}
 0x64c   : > { %1394 = dma.vmem_to_hbm [thread:$0]  (%p2231_p8), %s2147_s10, 128, %s2145_s15, %s1071_s21  }
 0x64d PF: > { %s2232_s24 = sld [smem:[#allocation23_spill]]  ;;  %s2233_s30 = sld [smem:[#allocation20_spill]] }
 0x64e   : > { %s1119_s25 = sand.u32 1, %s1716_s18  }
 0x64f   : > { %s1120_s1 = scalar_lea.sflag [#allocation4], %s1119_s25 }
 0x653   : > { %p2234_p5 = scmp.ne.s32.totalorder %s2232_s24, 0  ;;  %p2235_p0 = scmp.ge.s32.totalorder %s2233_s30, 2 }
 0x655   : > { %p1412_p3 = pnand %p2235_p0, %p2234_p5 }
 0x657   : > { %1707 = dma.done.wait (!%p1412_p3), %s1120_s1, 128  }
 0x658   : > { %1709 = vsyncadd (!%p1412_p3), %s1120_s1, 4294967168  ;;  %s1129_s27 = scalar_lea.sflag [#allocation12], %s1119_s25 }
 0x659   : > { %1711 = dma.done.wait (!%p1412_p3), %s1129_s27, 512  }
 0x65a   : > { %1713 = vsyncadd (!%p1412_p3), %s1129_s27, 4294966784  ;;  %s31_s23 = sadd.s32 1, %s2233_s30   ;;  %s2236_s6 = sld [smem:[#allocation18_spill]] }
 0x65b   : > { %p28_p1 = scmp.ge.s32.totalorder %s31_s23, 4   ;;  %s2237_s20 = sld [smem:[#allocation22_spill]] }
 0x65c   : > { %s2238_s21 = sld [smem:[#allocation19_spill]]  ;;  %s2239_s22 = sld [smem:[#allocation21_spill]] }
 0x65d   : > { %s2240_s18 = smov %s1720_s19  ;;  %30 = sbr.rel (!%p28_p1) target bundleno = 14 (0xe), region = 138 }
 0x660   : > { %s2241_s19 = smov %s2236_s6 }
 0x664   :  { %1134 = vsyncpa [#allocation3], 1 }
 0x665   :  { %1136 = vsyncpa [#allocation3 + $0x1], 1 }
 0x666   :  { %1137 = vsyncpa [#allocation6], 1 }
 0x667   :  { %1139 = vsyncpa [#allocation6 + $0x1], 1 }
 0x668   :  { %1140 = vsyncpa [#allocation9], 1 }
 0x669   :  { %1142 = vsyncpa [#allocation9 + $0x1], 1 }
 0x66a   :  { %1143 = vsyncpa [#allocation4], 1 }
 0x66b   :  { %1145 = vsyncpa [#allocation4 + $0x1], 1 }
 0x66c   :  { %1146 = vsyncpa [#allocation12], 1 }
 0x66d   :  { %1148 = vsyncpa [#allocation12 + $0x1], 1 }

</bundles_post_ra>
